<compile_context>
chip_gen: v5e
topology: v5e:2x2
jax: 0.10.0
libtpu: 0.0.40
codegen_flags: <defaults>
</compile_context>

<pallas_src>
import functools

import jax
import jax.numpy as jnp
from jax.experimental import pallas as pl
from jax.experimental.pallas import tpu as pltpu


def _round_up(n, m):
    return ((n + m - 1) // m) * m


def _cdiv(a, b):
    return (a + b - 1) // b


def _mlp_kernel(x_ref,
                w1_ref,
                w2_ref, b2_ref,
                w3_ref, b3_ref,
                w4_ref, b4_ref,
                o_ref):
    # Transposed layout: batch on the lane axis, features on the sublane axis.
    x = x_ref[...]                                               # (6, TB) bf16

    # Layer 1: b1 folded into w1 via the ones row of x.  f32 accumulate on the
    # MXU, single bf16 downcast, ReLU in bf16.
    h = jnp.dot(w1_ref[...], x,
                preferred_element_type=jnp.float32).astype(jnp.bfloat16)
    h = jnp.maximum(h, 0.0)                                      # (64, TB) bf16

    h = jnp.dot(w2_ref[...], h,
                preferred_element_type=jnp.float32).astype(jnp.bfloat16)
    h = jnp.maximum(h + b2_ref[...], 0.0)                        # (128, TB) bf16

    h = jnp.dot(w3_ref[...], h,
                preferred_element_type=jnp.float32).astype(jnp.bfloat16)
    h = jnp.maximum(h + b3_ref[...], 0.0)                        # (64, TB) bf16

    h = jnp.dot(w4_ref[...], h,
                preferred_element_type=jnp.float32).astype(jnp.bfloat16)
    h = h + b4_ref[...]                                          # (2, TB) bf16

    o_ref[...] = h.astype(o_ref.dtype)


@functools.partial(jax.jit, static_argnames=("tb",))
def smart_rally_net(x, params, *, tb=8192):
    """Forward pass of SmartRallyNet.

    x: (B, 5) float32
    params: dict with w1..w4 in PyTorch (out, in) layout and b1..b4 as
            (out, 1) float32 columns.
    returns: (B, 2) float32

    tb: batch-tile width (lanes).  Sweep 4096-16384 per generation; keep
        <= ~8192 on v7x (64 MiB physical VMEM) unless vmem_limit_bytes is
        raised accordingly.
    """
    B, f_in = x.shape
    assert f_in == 5

    # Lane-align the batch, then pick a tile that divides the padded batch
    # (avoids a whole extra zero tile for ragged batch sizes).  For large
    # batches force >= 2 grid steps so both v7x TensorCores get work.
    b_lane = _round_up(max(B, 1), 128)
    n_tiles = max(_cdiv(b_lane, tb), 1)
    if n_tiles == 1 and b_lane >= 2048:
        n_tiles = 2
    tb_eff = _round_up(_cdiv(b_lane, n_tiles), 128)
    b_pad = n_tiles * tb_eff
    grid = (n_tiles,)

    # Transposed bf16 input with an appended ones row (folds b1 into w1):
    # (6, b_pad), batch on lanes.  concat + pad fuses better than
    # zeros + dynamic-update-slice.
    ones = jnp.ones((B, 1), jnp.float32)
    x_aug = jnp.concatenate([x, ones], axis=1).astype(jnp.bfloat16).T  # (6, B)
    x_t = jnp.pad(x_aug, ((0, 0), (0, b_pad - B)))

    # Weights in bf16 for the MXU; b1 folded into w1, remaining biases bf16
    # (out, 1) columns for the bf16 epilogue.
    w1 = jnp.concatenate([params["w1"], params["b1"]], axis=1).astype(jnp.bfloat16)  # (64, 6)
    w2 = params["w2"].astype(jnp.bfloat16)     # (128, 64)
    w3 = params["w3"].astype(jnp.bfloat16)     # (64, 128)
    w4 = params["w4"].astype(jnp.bfloat16)     # (2, 64)
    b2 = params["b2"].astype(jnp.bfloat16)     # (128, 1)
    b3 = params["b3"].astype(jnp.bfloat16)     # (64, 1)
    b4 = params["b4"].astype(jnp.bfloat16)     # (2, 1)

    def resident(shape):
        # Whole-array block, same block every grid step -> DMA'd once.
        return pl.BlockSpec(shape, lambda i: (0, 0))

    x_spec = pl.BlockSpec((6, tb_eff), lambda i: (0, i))
    o_spec = pl.BlockSpec((2, tb_eff), lambda i: (0, i))

    param_bytes = sum(int(p.size) * p.dtype.itemsize
                      for p in (w1, w2, b2, w3, b3, w4, b4))
    flops = 2 * b_pad * (6 * 64 + 64 * 128 + 128 * 64 + 64 * 2)
    bytes_accessed = 6 * b_pad * 2 + 2 * b_pad * 2 + param_bytes

    out_t = pl.pallas_call(
        _mlp_kernel,
        out_shape=jax.ShapeDtypeStruct((2, b_pad), jnp.bfloat16),
        grid=grid,
        in_specs=[
            x_spec,
            resident((64, 6)),
            resident((128, 64)), resident((128, 1)),
            resident((64, 128)), resident((64, 1)),
            resident((2, 64)), resident((2, 1)),
        ],
        out_specs=o_spec,
        compiler_params=pltpu.CompilerParams(
            dimension_semantics=("parallel",),
            vmem_limit_bytes=32 * 1024 * 1024),
        cost_estimate=pl.CostEstimate(
            flops=flops, transcendentals=0, bytes_accessed=bytes_accessed),
    )(x_t, w1, w2, b2, w3, b3, w4, b4)

    return out_t[:, :B].T.astype(jnp.float32)


def init_params(key):
    """Deterministic init matching nn.Linear shapes (weight (out, in))."""
    dims = [(5, 64), (64, 128), (128, 64), (64, 2)]
    params = {}
    for i, (fan_in, fan_out) in enumerate(dims, start=1):
        key, kw, kb = jax.random.split(key, 3)
        bound = 1.0 / float(fan_in) ** 0.5  # PyTorch default uniform bound
        params[f"w{i}"] = jax.random.uniform(
            kw, (fan_out, fan_in), jnp.float32, -bound, bound)
        params[f"b{i}"] = jax.random.uniform(
            kb, (fan_out, 1), jnp.float32, -bound, bound)
    return params


def reference_forward(x, params):
    """Pure-JAX reference matching the kernel's bf16 math.

    Note: the original PyTorch module is full f32; the bf16 cast is an
    accepted ~1e-3 relative-error deviation (see perf review).
    """
    bf = jnp.bfloat16

    # Layer 1 (bias folded into the f32 accumulator, like the kernel).
    h = (jnp.dot(x.astype(bf), params["w1"].astype(bf).T,
                 preferred_element_type=jnp.float32)
         + params["b1"][:, 0]).astype(bf)
    h = jnp.maximum(h, 0.0)

    def lin(h, w, b):
        y = jnp.dot(h, w.astype(bf).T,
                    preferred_element_type=jnp.float32).astype(bf)
        return y + b[:, 0].astype(bf)

    h = jnp.maximum(lin(h, params["w2"], params["b2"]), 0.0)
    h = jnp.maximum(lin(h, params["w3"], params["b3"]), 0.0)
    return lin(h, params["w4"], params["b4"]).astype(jnp.float32)


if __name__ == "__main__":
    key = jax.random.PRNGKey(0)
    key, kx = jax.random.split(key)

    batch = 8
    x = jax.random.normal(kx, (batch, 5), jnp.float32)
    params = init_params(key)

    out = smart_rally_net(x, params)
    out = jax.block_until_ready(out)
    assert out.shape == (batch, 2)

    ref = reference_forward(x, params)
    assert jnp.allclose(out, ref, atol=2e-2, rtol=2e-2), "mismatch vs reference"

    print("KERNEL_OK")
</pallas_src>

<mosaic_0001>
module attributes {stable_mosaic.version = 11 : i64} {
  func.func @_mlp_kernel(%arg0: i32, %arg1: memref<6x128xbf16, #tpu.memory_space<vmem>>, %arg2: memref<64x6xbf16, #tpu.memory_space<vmem>>, %arg3: memref<128x64xbf16, #tpu.memory_space<vmem>>, %arg4: memref<128x1xbf16, #tpu.memory_space<vmem>>, %arg5: memref<64x128xbf16, #tpu.memory_space<vmem>>, %arg6: memref<64x1xbf16, #tpu.memory_space<vmem>>, %arg7: memref<2x64xbf16, #tpu.memory_space<vmem>>, %arg8: memref<2x1xbf16, #tpu.memory_space<vmem>>, %arg9: memref<2x128xbf16, #tpu.memory_space<vmem>>) attributes {dimension_semantics = [#tpu.dimension_semantics<parallel>], iteration_bounds = array<i64: 1>, scalar_prefetch = 0 : i64, scratch_operands = 0 : i64, tpu.core_type = #tpu.core_type<tc>, window_params = [{transform_indices = @transform_0, window_bounds = array<i64: 6, 128>}, {pipeline_mode = #tpu.pipeline_mode<synchronous>, transform_indices = @transform_1, window_bounds = array<i64: 64, 6>}, {pipeline_mode = #tpu.pipeline_mode<synchronous>, transform_indices = @transform_2, window_bounds = array<i64: 128, 64>}, {pipeline_mode = #tpu.pipeline_mode<synchronous>, transform_indices = @transform_3, window_bounds = array<i64: 128, 1>}, {pipeline_mode = #tpu.pipeline_mode<synchronous>, transform_indices = @transform_4, window_bounds = array<i64: 64, 128>}, {pipeline_mode = #tpu.pipeline_mode<synchronous>, transform_indices = @transform_5, window_bounds = array<i64: 64, 1>}, {pipeline_mode = #tpu.pipeline_mode<synchronous>, transform_indices = @transform_6, window_bounds = array<i64: 2, 64>}, {pipeline_mode = #tpu.pipeline_mode<synchronous>, transform_indices = @transform_7, window_bounds = array<i64: 2, 1>}, {transform_indices = @transform_8, window_bounds = array<i64: 2, 128>}]} {
    %c0 = arith.constant 0 : index
    %c0_0 = arith.constant 0 : index
    %0 = vector.load %arg1[%c0, %c0_0] : memref<6x128xbf16, #tpu.memory_space<vmem>>, vector<6x128xbf16>
    %c0_1 = arith.constant 0 : index
    %c0_2 = arith.constant 0 : index
    %1 = vector.load %arg2[%c0_1, %c0_2] : memref<64x6xbf16, #tpu.memory_space<vmem>>, vector<64x6xbf16>
    %cst = arith.constant dense<0.000000e+00> : vector<64x128xf32>
    %2 = tpu.matmul %1, %0, %cst {dimension_numbers = #tpu.dot_dimension_numbers<[1], [0], [0], [1], [0, 0, 1, 1], [], []>} : vector<64x6xbf16>, vector<6x128xbf16>, vector<64x128xf32> -> vector<64x128xf32>
    %3 = arith.truncf %2 : vector<64x128xf32> to vector<64x128xbf16>
    %cst_3 = arith.constant 0.000000e+00 : bf16
    %4 = vector.broadcast %cst_3 : bf16 to vector<64x128xbf16>
    %5 = arith.maximumf %3, %4 : vector<64x128xbf16>
    %c0_4 = arith.constant 0 : index
    %c0_5 = arith.constant 0 : index
    %6 = vector.load %arg3[%c0_4, %c0_5] : memref<128x64xbf16, #tpu.memory_space<vmem>>, vector<128x64xbf16>
    %cst_6 = arith.constant dense<0.000000e+00> : vector<128x128xf32>
    %7 = tpu.matmul %6, %5, %cst_6 {dimension_numbers = #tpu.dot_dimension_numbers<[1], [0], [0], [1], [0, 0, 1, 1], [], []>} : vector<128x64xbf16>, vector<64x128xbf16>, vector<128x128xf32> -> vector<128x128xf32>
    %8 = arith.truncf %7 : vector<128x128xf32> to vector<128x128xbf16>
    %c0_7 = arith.constant 0 : index
    %c0_8 = arith.constant 0 : index
    %9 = vector.load %arg4[%c0_7, %c0_8] : memref<128x1xbf16, #tpu.memory_space<vmem>>, vector<128x1xbf16>
    %10 = vector.broadcast %9 : vector<128x1xbf16> to vector<128x128xbf16>
    %11 = arith.addf %8, %10 : vector<128x128xbf16>
    %cst_9 = arith.constant 0.000000e+00 : bf16
    %12 = vector.broadcast %cst_9 : bf16 to vector<128x128xbf16>
    %13 = arith.maximumf %11, %12 : vector<128x128xbf16>
    %c0_10 = arith.constant 0 : index
    %c0_11 = arith.constant 0 : index
    %14 = vector.load %arg5[%c0_10, %c0_11] : memref<64x128xbf16, #tpu.memory_space<vmem>>, vector<64x128xbf16>
    %cst_12 = arith.constant dense<0.000000e+00> : vector<64x128xf32>
    %15 = tpu.matmul %14, %13, %cst_12 {dimension_numbers = #tpu.dot_dimension_numbers<[1], [0], [0], [1], [0, 0, 1, 1], [], []>} : vector<64x128xbf16>, vector<128x128xbf16>, vector<64x128xf32> -> vector<64x128xf32>
    %16 = arith.truncf %15 : vector<64x128xf32> to vector<64x128xbf16>
    %c0_13 = arith.constant 0 : index
    %c0_14 = arith.constant 0 : index
    %17 = vector.load %arg6[%c0_13, %c0_14] : memref<64x1xbf16, #tpu.memory_space<vmem>>, vector<64x1xbf16>
    %18 = vector.broadcast %17 : vector<64x1xbf16> to vector<64x128xbf16>
    %19 = arith.addf %16, %18 : vector<64x128xbf16>
    %cst_15 = arith.constant 0.000000e+00 : bf16
    %20 = vector.broadcast %cst_15 : bf16 to vector<64x128xbf16>
    %21 = arith.maximumf %19, %20 : vector<64x128xbf16>
    %c0_16 = arith.constant 0 : index
    %c0_17 = arith.constant 0 : index
    %22 = vector.load %arg7[%c0_16, %c0_17] : memref<2x64xbf16, #tpu.memory_space<vmem>>, vector<2x64xbf16>
    %cst_18 = arith.constant dense<0.000000e+00> : vector<2x128xf32>
    %23 = tpu.matmul %22, %21, %cst_18 {dimension_numbers = #tpu.dot_dimension_numbers<[1], [0], [0], [1], [0, 0, 1, 1], [], []>} : vector<2x64xbf16>, vector<64x128xbf16>, vector<2x128xf32> -> vector<2x128xf32>
    %24 = arith.truncf %23 : vector<2x128xf32> to vector<2x128xbf16>
    %c0_19 = arith.constant 0 : index
    %c0_20 = arith.constant 0 : index
    %25 = vector.load %arg8[%c0_19, %c0_20] : memref<2x1xbf16, #tpu.memory_space<vmem>>, vector<2x1xbf16>
    %26 = vector.broadcast %25 : vector<2x1xbf16> to vector<2x128xbf16>
    %27 = arith.addf %24, %26 : vector<2x128xbf16>
    %c0_21 = arith.constant 0 : index
    %c0_22 = arith.constant 0 : index
    %28 = vector.load %arg9[%c0_21, %c0_22] : memref<2x128xbf16, #tpu.memory_space<vmem>>, vector<2x128xbf16>
    tpu.vector_store %arg9[%c0_21, %c0_22], %27 {strides = array<i32>} : memref<2x128xbf16, #tpu.memory_space<vmem>>, vector<2x128xbf16>,
    return
  }
  func.func @transform_0(%arg0: i32) -> (i32, i32) {
    %c0_i32 = arith.constant 0 : i32
    %c0_i32_0 = arith.constant 0 : i32
    return %c0_i32, %arg0 : i32, i32
  }
  func.func @transform_1(%arg0: i32) -> (i32, i32) {
    %c0_i32 = arith.constant 0 : i32
    %c0_i32_0 = arith.constant 0 : i32
    %c0_i32_1 = arith.constant 0 : i32
    return %c0_i32, %c0_i32_0 : i32, i32
  }
  func.func @transform_2(%arg0: i32) -> (i32, i32) {
    %c0_i32 = arith.constant 0 : i32
    %c0_i32_0 = arith.constant 0 : i32
    %c0_i32_1 = arith.constant 0 : i32
    return %c0_i32, %c0_i32_0 : i32, i32
  }
  func.func @transform_3(%arg0: i32) -> (i32, i32) {
    %c0_i32 = arith.constant 0 : i32
    %c0_i32_0 = arith.constant 0 : i32
    %c0_i32_1 = arith.constant 0 : i32
    return %c0_i32, %c0_i32_0 : i32, i32
  }
  func.func @transform_4(%arg0: i32) -> (i32, i32) {
    %c0_i32 = arith.constant 0 : i32
    %c0_i32_0 = arith.constant 0 : i32
    %c0_i32_1 = arith.constant 0 : i32
    return %c0_i32, %c0_i32_0 : i32, i32
  }
  func.func @transform_5(%arg0: i32) -> (i32, i32) {
    %c0_i32 = arith.constant 0 : i32
    %c0_i32_0 = arith.constant 0 : i32
    %c0_i32_1 = arith.constant 0 : i32
    return %c0_i32, %c0_i32_0 : i32, i32
  }
  func.func @transform_6(%arg0: i32) -> (i32, i32) {
    %c0_i32 = arith.constant 0 : i32
    %c0_i32_0 = arith.constant 0 : i32
    %c0_i32_1 = arith.constant 0 : i32
    return %c0_i32, %c0_i32_0 : i32, i32
  }
  func.func @transform_7(%arg0: i32) -> (i32, i32) {
    %c0_i32 = arith.constant 0 : i32
    %c0_i32_0 = arith.constant 0 : i32
    %c0_i32_1 = arith.constant 0 : i32
    return %c0_i32, %c0_i32_0 : i32, i32
  }
  func.func @transform_8(%arg0: i32) -> (i32, i32) {
    %c0_i32 = arith.constant 0 : i32
    %c0_i32_0 = arith.constant 0 : i32
    return %c0_i32, %arg0 : i32, i32
  }
}

</mosaic_0001>

<bundles_post_ra>
// kernel: smart_rally_net.1
= control target key start
LH: loop header
LB: loop body
LE: loop exit
PB: predicated region body
PF: predicated region fallthrough
CT: control target
= control target key end

     0   :  { %vm72_vm0 = vcmask 1042432   ;;  %vm59_vm1 = vcmask 48128   ;;  %v880_v10 = vmov 0   ;;  %vm189_vm2 = vcmask 523264   ;;  %s1128_s0 = inlined_call_operand.vmem [shape: bf16[6,128], index: 0, kind: input, shape index: {}]   ;;  %s1129_s1 = inlined_call_operand.vmem [shape: bf16[64,6], index: 1, kind: input, shape index: {}]   ;;  %s1130_s3 = inlined_call_operand.vmem [shape: bf16[128,1], index: 3, kind: input, shape index: {}]   ;;  %s1131_s2 = inlined_call_operand.vmem [shape: bf16[128,64], index: 2, kind: input, shape index: {}]   ;;  %s1132_s5 = inlined_call_operand.vmem [shape: bf16[64,1], index: 5, kind: input, shape index: {}]   ;;  %s1133_s7 = inlined_call_operand.vmem [shape: bf16[2,1], index: 7, kind: input, shape index: {}]   ;;  %s1134_s4 = inlined_call_operand.vmem [shape: bf16[64,128], index: 4, kind: input, shape index: {}]   ;;  %s1135_s6 = inlined_call_operand.vmem [shape: bf16[2,64], index: 6, kind: input, shape index: {}]   ;;  %s1136_s8 = inlined_call_operand.vmem [shape: bf16[2,128], index: 8, kind: output, shape index: {}]  }
   0x1   :  { %v30_v0 = vld [vmem:[%s1128_s0] sm:$0x7]  ;;  %v856_v3 = vld [vmem:[%s1129_s1 + $0x8] sm:$0xff]  ;;  %v857_v4 = vld [vmem:[%s1129_s1 + $0x10] sm:$0xff]  ;;  %877 = vset.pattern.permute.xlu0 %v880_v10  ;;  %879 = vset.pattern.permute.xlu2 %v880_v10 }
   0x2   :  { %v74_v1 = vsel %vm72_vm0, %v30_v0, 0  ;;  %v855_v2 = vld [vmem:[%s1129_s1] sm:$0xff]  ;;  %v858_v5 = vld [vmem:[%s1129_s1 + $0x18] sm:$0xff]  ;;  %878 = vset.pattern.permute.xlu1 %v880_v10  ;;  %v291_v16 = vld [vmem:[%s1130_s3 + $0x30] sm:$0xf] }
   0x3   :  { %83 = vmatpush.bf16.msra.mxu0 %v74_v1  ;;  %v293_v9 = vld [vmem:[%s1130_s3 + $0x38] sm:$0xf]  ;;  %v294_v12 = vld [vmem:[%s1130_s3 + $0x3c] sm:$0xf]  ;;  %v287_v14 = vld [vmem:[%s1130_s3 + $0x20] sm:$0xf]  ;;  %405 = vperm.xlu1 %878, %v291_v16  }
   0x4   :  { %423 = vperm.xlu0 %877, %v293_v9   ;;  %v289_v17 = vld [vmem:[%s1130_s3 + $0x28] sm:$0xf]  ;;  %v286_v18 = vld [vmem:[%s1130_s3 + $0x1c] sm:$0xf]  ;;  %v292_v20 = vld [vmem:[%s1130_s3 + $0x34] sm:$0xf] }
   0x5   :  { %387 = vperm.xlu2 %879, %v289_v17   ;;  %v290_v21 = vld [vmem:[%s1130_s3 + $0x2c] sm:$0xf]  ;;  %v281_v22 = vld [vmem:[%s1130_s3 + $0x8] sm:$0xf]  ;;  %v288_v28 = vld [vmem:[%s1130_s3 + $0x24] sm:$0xf] }
   0x6   :  { %794 = vmatmul.msk.bf16.vlgmr.msra.gmra.mxu0 %vm59_vm1, %v855_v2  ;;  %v285_v29 = vld [vmem:[%s1130_s3 + $0x18] sm:$0xf]  ;;  %v280_v30 = vld [vmem:[%s1130_s3 + $0x4] sm:$0xf]  ;;  %v284_v37 = vld [vmem:[%s1130_s3 + $0x14] sm:$0xf] }
   0x7   :  { %v283_v38 = vld [vmem:[%s1130_s3 + $0x10] sm:$0xf]  ;;  %v859_v41 = vld [vmem:[%s1131_s2] sm:$0xff]  ;;  %v864_v42 = vld [vmem:[%s1131_s2 + $0x28] sm:$0xff] }
   0x8   :  { %v282_v43 = vld [vmem:[%s1130_s3 + $0xc] sm:$0xf]  ;;  %v279_v44 = vld [vmem:[%s1130_s3] sm:$0xf]  ;;  %v616_v45 = vld [vmem:[%s1132_s5 + $0x10] sm:$0xf] }
   0x9   :  { %v618_v46 = vld [vmem:[%s1132_s5 + $0x18] sm:$0xf]  ;;  %v860_v47 = vld [vmem:[%s1131_s2 + $0x8] sm:$0xff]  ;;  %v865_v48 = vld [vmem:[%s1131_s2 + $0x30] sm:$0xff] }
   0xa   :  { %v615_v49 = vld [vmem:[%s1132_s5 + $0xc] sm:$0xf]  ;;  %v617_v50 = vld [vmem:[%s1132_s5 + $0x14] sm:$0xf]  ;;  %v762_v51 = vld [vmem:[%s1133_s7] sm:$0x1] }
   0xb   :  { %414 = vperm.xlu1 %878, %v292_v20   ;;  %v612_v52 = vld [vmem:[%s1132_s5] sm:$0xf]  ;;  %v861_v53 = vld [vmem:[%s1131_s2 + $0x10] sm:$0xff]  ;;  %v866_v54 = vld [vmem:[%s1131_s2 + $0x38] sm:$0xff] }
   0xc   :  { %432 = vperm.xlu0 %877, %v294_v12   ;;  %v619_v55 = vld [vmem:[%s1132_s5 + $0x1c] sm:$0xf]  ;;  %v614_v56 = vld [vmem:[%s1132_s5 + $0x8] sm:$0xf]  ;;  %v613_v58 = vld [vmem:[%s1132_s5 + $0x4] sm:$0xf] }
   0xd   :  { %396 = vperm.xlu2 %879, %v290_v21   ;;  %v862_v57 = vld [vmem:[%s1131_s2 + $0x18] sm:$0xff]  ;;  %v863_v59 = vld [vmem:[%s1131_s2 + $0x20] sm:$0xff] }
  0x13   :  { %378 = vperm.xlu1 %878, %v288_v28  }
  0x14   :  { %369 = vperm.xlu0 %877, %v287_v14  }
  0x15   :  { %351 = vperm.xlu2 %879, %v285_v29  }
  0x16   :  { %795 = vmatmul.msk.bf16.gmra.mxu0 %vm59_vm1, %v856_v3 }
  0x1b   :  { %333 = vperm.xlu1 %878, %v283_v38  }
  0x1c   :  { %360 = vperm.xlu0 %877, %v286_v18  }
  0x1d   :  { %342 = vperm.xlu2 %879, %v284_v37  }
  0x23   :  { %324 = vperm.xlu1 %878, %v282_v43  }
  0x24   :  { %315 = vperm.xlu0 %877, %v281_v22  }
  0x25   :  { %297 = vperm.xlu2 %879, %v279_v44  }
  0x26   :  { %796 = vmatmul.msk.bf16.gmra.mxu0 %vm59_vm1, %v857_v4 }
  0x2b   :  { %676 = vperm.xlu1 %878, %v618_v46  }
  0x2c   :  { %306 = vperm.xlu0 %877, %v280_v30  }
  0x2d   :  { %685 = vperm.xlu2 %879, %v619_v55  }
  0x33   :  { %667 = vperm.xlu1 %878, %v617_v50  }
  0x34   :  { %658 = vperm.xlu0 %877, %v616_v45  }
  0x35   :  { %640 = vperm.xlu2 %879, %v614_v56  }
  0x36   :  { %797 = vmatmul.msk.bf16.gmra.mxu0 %vm59_vm1, %v858_v5  ;;  %v881_v5 = vmov 839922192  }
  0x3b   :  { %622 = vperm.xlu1 %878, %v612_v52  }
  0x3c   :  { %649 = vperm.xlu0 %877, %v615_v49  }
  0x3d   :  { %631 = vperm.xlu2 %879, %v613_v58  }
  0x44   :  { %765 = vperm.xlu0 %877, %v762_v51  }
  0x5f   :  { %v388_v61 = vpop.permute.xlu2 %387 }
  0x67   :  { %v397_v63 = vpop.permute.xlu2 %396 }
  0x6f   :  { %v1051_v1 = vpop.permute.xlu2 %351 }
  0x76   :  { %v424_v60 = vpop.permute.xlu0 %423 }
  0x77   :  { %v1055_v3 = vpop.permute.xlu2 %342 }
  0x7e   :  { %v433_v62 = vpop.permute.xlu0 %432 }
  0x83   :  { %v85_v6 = vpop.f32.mrf.mxu0 }
  0x84   :  { %v121_v39 = vmax.f32 %v85_v6, 0.0  ;;  %v301_v6 = vunpack.c.l.s4 %v881_v5 }
  0x86   :  { %v1049_v0 = vpop.permute.xlu0 %369 }
  0x8b   :  { %v87_v7 = vpop.f32.mrf.mxu0 }
  0x8c   :  { %v122_v35 = vmax.f32 %v87_v7, 0.0  ;;  %v1059_v7 = vunpack.c.0.s8 %v301_v6 }
  0x8e   :  { %v129_v40 = vpack.c.bf16 %v122_v35, %v121_v39  ;;  %v1053_v2 = vpop.permute.xlu0 %360  ;;  %v438_v37 = vperm.slane %v433_v62, %v1059_v7  ;;  %v393_v45 = vperm.slane %v388_v61, %v1059_v7 }
  0x90   :  { %v470_v46 = vunpack.c.l.bf16 %v438_v37 }
  0x93   :  { %v90_v8 = vpop.f32.mrf.mxu0 }
  0x94   :  { %v123_v34 = vmax.f32 %v90_v8, 0.0  ;;  %v298_v8 = vpop.permute.xlu2 %297 }
  0x96   :  { %v1057_v4 = vpop.permute.xlu0 %315 }
  0x9b   :  { %v92_v11 = vpop.f32.mrf.mxu0 }
  0x9c   :  { %v124_v32 = vmax.f32 %v92_v11, 0.0  ;;  %v303_v11 = vperm.slane %v298_v8, %v1059_v7 }
  0x9e   :  { %v130_v36 = vpack.c.bf16 %v124_v32, %v123_v34  ;;  %v307_v10 = vpop.permute.xlu0 %306  ;;  %v429_v34 = vperm.slane %v424_v60, %v1059_v7 }
  0xa3   :  { %v95_v13 = vpop.f32.mrf.mxu0 }
  0xa4   :  { %v125_v31 = vmax.f32 %v95_v13, 0.0  ;;  %v312_v13 = vperm.slane %v307_v10, %v1059_v7 }
  0xa6   :  { %v456_v18 = vunpack.c.l.bf16 %v312_v13 }
  0xab   :  { %v97_v15 = vpop.f32.mrf.mxu0 }
  0xac   :  { %v126_v26 = vmax.f32 %v97_v15, 0.0  ;;  %v455_v15 = vunpack.c.l.bf16 %v303_v11 }
  0xae   :  { %v131_v33 = vpack.c.bf16 %v126_v26, %v125_v31  ;;  %v406_v31 = vpop.permute.xlu1 %405 }
  0xaf   :  { %v411_v39 = vperm.slane %v406_v31, %v1059_v7 }
  0xb3   :  { %v100_v19 = vpop.f32.mrf.mxu0 }
  0xb4   :  { %v127_v24 = vmax.f32 %v100_v19, 0.0 }
  0xb6   :  { %v415_v38 = vpop.permute.xlu1 %414 }
  0xbb   :  { %v102_v23 = vpop.f32.mrf.mxu0 }
  0xbc   :  { %v128_v25 = vmax.f32 %v102_v23, 0.0 }
  0xbe   :  { %v132_v27 = vpack.c.bf16 %v128_v25, %v127_v24 }
  0xc0   :  { %218 = vmatpush.bf16.msra.mxu1 %v132_v27  ;;  %871 = vmatpush.bf16.msra.mxu3 %v132_v27 }
  0xc4   :  { %219 = vmatpush.bf16.msra.mxu1 %v131_v33  ;;  %872 = vmatpush.bf16.msra.mxu3 %v131_v33 }
  0xc8   :  { %220 = vmatpush.bf16.msra.mxu1 %v130_v36  ;;  %873 = vmatpush.bf16.msra.mxu3 %v130_v36 }
  0xcc   :  { %221 = vmatpush.bf16.msra.mxu1 %v129_v40  ;;  %874 = vmatpush.bf16.msra.mxu3 %v129_v40  ;;  %v420_v40 = vperm.slane %v415_v38, %v1059_v7 }
  0xce   :  { %v468_v49 = vunpack.c.l.bf16 %v420_v40 }
  0xcf   :  { %830 = vmatmul.msk.bf16.vlgmr.msra.gmra.mxu1 %vm189_vm2, %v859_v41  ;;  %835 = vmatmul.msk.bf16.vlgmr.msra.gmra.mxu3 %vm189_vm2, %v864_v42  ;;  %v469_v41 = vunpack.c.l.bf16 %v429_v34 }
  0xdf   :  { %831 = vmatmul.msk.bf16.gmra.mxu1 %vm189_vm2, %v860_v47  ;;  %836 = vmatmul.msk.bf16.gmra.mxu3 %vm189_vm2, %v865_v48  ;;  %v402_v47 = vperm.slane %v397_v63, %v1059_v7  ;;  %v467_v48 = vunpack.c.l.bf16 %v411_v39  ;;  %v379_v63 = vpop.permute.xlu1 %378 }
  0xe0   :  { %v384_v31 = vperm.slane %v379_v63, %v1059_v7 }
  0xe1   :  { %v466_v60 = vunpack.c.l.bf16 %v402_v47 }
  0xef   :  { %832 = vmatmul.msk.bf16.gmra.mxu1 %vm189_vm2, %v861_v53  ;;  %837 = vmatmul.msk.bf16.gmra.mxu3 %vm189_vm2, %v866_v54 }
  0xff   :  { %833 = vmatmul.msk.bf16.gmra.mxu1 %vm189_vm2, %v862_v57 }
 0x10f   :  { %834 = vmatmul.msk.bf16.gmra.mxu1 %vm189_vm2, %v863_v59  ;;  %v465_v59 = vunpack.c.l.bf16 %v393_v45 }
 0x14c   :  { %v223_v9 = vpop.f32.mrf.mxu1 }
 0x14d   :  { %v263_v12 = vpack.c.bf16 %v223_v9, %v223_v9 }
 0x14f   :  { %v439_v16 = vunpack.c.l.bf16 %v263_v12 }
 0x151   :  { %v471_v20 = vadd.f32 %v455_v15, %v439_v16 }
 0x152   :  { %v248_v14 = vpop.f32.mrf.mxu3 }
 0x153   :  { %v519_v24 = vmax.f32 %v471_v20, 0.0  ;;  %v273_v50 = vpack.c.bf16 %v248_v14, %v248_v14  ;;  %v334_v20 = vpop.permute.xlu1 %333 }
 0x154   :  { %v225_v17 = vpop.f32.mrf.mxu1 }
 0x155   :  { %v264_v19 = vpack.c.bf16 %v225_v17, %v225_v17  ;;  %v449_v62 = vunpack.c.l.bf16 %v273_v50 }
 0x157   :  { %v440_v21 = vunpack.c.l.bf16 %v264_v19  ;;  %v481_v11 = vadd.f32 %v465_v59, %v449_v62 }
 0x159   :  { %v472_v22 = vadd.f32 %v456_v18, %v440_v21  ;;  %v529_v18 = vmax.f32 %v481_v11, 0.0 }
 0x15a   :  { %v250_v23 = vpop.f32.mrf.mxu3 }
 0x15b   :  { %v520_v25 = vmax.f32 %v472_v22, 0.0  ;;  %v274_v51 = vpack.c.bf16 %v250_v23, %v250_v23  ;;  %v325_v39 = vpop.permute.xlu1 %324 }
 0x15c   :  { %v1063_v26 = vpop.f32.mrf.mxu1 }
 0x15d   :  { %v1065_v27 = vpack.c.bf16 %v520_v25, %v519_v24  ;;  %v450_v5 = vunpack.c.l.bf16 %v274_v51  ;;  %v375_v24 = vperm.slane %v1049_v0, %v1059_v7 }
 0x15f   :  { %v482_v12 = vadd.f32 %v466_v60, %v450_v5  ;;  %v463_v38 = vunpack.c.l.bf16 %v375_v24 }
 0x161   :  { %v530_v19 = vmax.f32 %v482_v12, 0.0 }
 0x162   :  { %v253_v28 = vpop.f32.mrf.mxu3 }
 0x163   :  { %v275_v42 = vpack.c.bf16 %v253_v28, %v253_v28  ;;  %v540_v21 = vpack.c.bf16 %v530_v19, %v529_v18  ;;  %v357_v28 = vperm.slane %v1051_v1, %v1059_v7  ;;  %v870_v18 = vld [vmem:[%s1134_s4 + $0x18] sm:$0xff] }
 0x164   :  { %v1067_v29 = vpop.f32.mrf.mxu1 }
 0x165   :  { %v451_v53 = vunpack.c.l.bf16 %v275_v42  ;;  %v461_v42 = vunpack.c.l.bf16 %v357_v28  ;;  %v659_v28 = vpop.permute.xlu0 %658 }
 0x167   :  { %v483_v6 = vadd.f32 %v467_v48, %v451_v53  ;;  %v330_v48 = vperm.slane %v325_v39, %v1059_v7 }
 0x169   :  { %v531_v14 = vmax.f32 %v483_v6, 0.0 }
 0x16a   :  { %v255_v30 = vpop.f32.mrf.mxu3 }
 0x16b   :  { %v276_v43 = vpack.c.bf16 %v255_v30, %v255_v30  ;;  %v366_v30 = vperm.slane %v1053_v2, %v1059_v7  ;;  %v339_v2 = vperm.slane %v334_v20, %v1059_v7 }
 0x16c   :  { %v1069_v32 = vpop.f32.mrf.mxu1 }
 0x16d   :  { %v452_v54 = vunpack.c.l.bf16 %v276_v43  ;;  %v462_v1 = vunpack.c.l.bf16 %v366_v30  ;;  %v464_v43 = vunpack.c.l.bf16 %v384_v31  ;;  %v459_v53 = vunpack.c.l.bf16 %v339_v2 }
 0x16f   :  { %v484_v61 = vadd.f32 %v468_v49, %v452_v54  ;;  %v266_v49 = vpack.c.bf16 %v1067_v29, %v1067_v29  ;;  %v265_v54 = vpack.c.bf16 %v1063_v26, %v1063_v26 }
 0x171   :  { %v532_v15 = vmax.f32 %v484_v61, 0.0  ;;  %v442_v59 = vunpack.c.l.bf16 %v266_v49  ;;  %v441_v6 = vunpack.c.l.bf16 %v265_v54 }
 0x172   :  { %v258_v33 = vpop.f32.mrf.mxu3 }
 0x173   :  { %v277_v35 = vpack.c.bf16 %v258_v33, %v258_v33  ;;  %v541_v17 = vpack.c.bf16 %v532_v15, %v531_v14  ;;  %v867_v15 = vld [vmem:[%s1134_s4] sm:$0xff] }
 0x174   :  { %v1072_v36 = vpop.f32.mrf.mxu1 }
 0x175   :  { %v453_v44 = vunpack.c.l.bf16 %v277_v35  ;;  %v348_v35 = vperm.slane %v1055_v3, %v1059_v7  ;;  %v268_v0 = vpack.c.bf16 %v1072_v36, %v1072_v36 }
 0x177   :  { %v485_v56 = vadd.f32 %v469_v41, %v453_v44  ;;  %v267_v44 = vpack.c.bf16 %v1069_v32, %v1069_v32  ;;  %v460_v3 = vunpack.c.l.bf16 %v348_v35  ;;  %v444_v36 = vunpack.c.l.bf16 %v268_v0 }
 0x179   :  { %v533_v9 = vmax.f32 %v485_v56, 0.0  ;;  %v443_v32 = vunpack.c.l.bf16 %v267_v44  ;;  %v476_v60 = vadd.f32 %v460_v3, %v444_v36 }
 0x17a   :  { %v260_v52 = vpop.f32.mrf.mxu3 }
 0x17b   :  { %v278_v55 = vpack.c.bf16 %v260_v52, %v260_v52  ;;  %v321_v52 = vperm.slane %v1057_v4, %v1059_v7  ;;  %v475_v61 = vadd.f32 %v459_v53, %v443_v32  ;;  %v524_v63 = vmax.f32 %v476_v60, 0.0 }
 0x17c   :  { %v238_v57 = vpop.f32.mrf.mxu1 }
 0x17d   :  { %v454_v58 = vunpack.c.l.bf16 %v278_v55  ;;  %v269_v33 = vpack.c.bf16 %v238_v57, %v238_v57  ;;  %v457_v29 = vunpack.c.l.bf16 %v321_v52  ;;  %v523_v26 = vmax.f32 %v475_v61, 0.0 }
 0x17f   :  { %v486_v8 = vadd.f32 %v470_v46, %v454_v58  ;;  %v445_v45 = vunpack.c.l.bf16 %v269_v33  ;;  %v458_v58 = vunpack.c.l.bf16 %v330_v48  ;;  %v537_v11 = vpack.c.bf16 %v524_v63, %v523_v26 }
 0x181   :  { %v534_v10 = vmax.f32 %v486_v8, 0.0  ;;  %v477_v55 = vadd.f32 %v461_v42, %v445_v45 }
 0x183   :  { %v542_v13 = vpack.c.bf16 %v534_v10, %v533_v9  ;;  %v525_v8 = vmax.f32 %v477_v55, 0.0  ;;  %v474_v9 = vadd.f32 %v458_v58, %v442_v59  ;;  %v473_v10 = vadd.f32 %v457_v29, %v441_v6 }
 0x184   :  { %v240_v16 = vpop.f32.mrf.mxu1 }
 0x185   :  { %575 = vmatpush.bf16.msra.mxu2 %v542_v13  ;;  %v270_v25 = vpack.c.bf16 %v240_v16, %v240_v16  ;;  %v522_v12 = vmax.f32 %v474_v9, 0.0  ;;  %v521_v13 = vmax.f32 %v473_v10, 0.0  ;;  %v868_v16 = vld [vmem:[%s1134_s4 + $0x8] sm:$0xff] }
 0x187   :  { %v446_v40 = vunpack.c.l.bf16 %v270_v25  ;;  %v536_v14 = vpack.c.bf16 %v522_v12, %v521_v13  ;;  %v677_v25 = vpop.permute.xlu1 %676 }
 0x188   :  { %v682_v35 = vperm.slane %v677_v25, %v1059_v7 }
 0x189   :  { %576 = vmatpush.bf16.msra.mxu2 %v541_v17  ;;  %v478_v50 = vadd.f32 %v462_v1, %v446_v40  ;;  %v869_v17 = vld [vmem:[%s1134_s4 + $0x10] sm:$0xff] }
 0x18a   :  { %v706_v1 = vunpack.c.l.bf16 %v682_v35 }
 0x18b   :  { %v526_v5 = vmax.f32 %v478_v50, 0.0 }
 0x18c   :  { %v243_v22 = vpop.f32.mrf.mxu1 }
 0x18d   :  { %577 = vmatpush.bf16.msra.mxu2 %v540_v21  ;;  %v271_v23 = vpack.c.bf16 %v243_v22, %v243_v22  ;;  %v538_v4 = vpack.c.bf16 %v526_v5, %v525_v8 }
 0x18f   :  { %v447_v34 = vunpack.c.l.bf16 %v271_v23  ;;  %v686_v23 = vpop.permute.xlu2 %685  ;;  %v668_v33 = vpop.permute.xlu1 %667 }
 0x190   :  { %v673_v39 = vperm.slane %v668_v33, %v1059_v7 }
 0x191   :  { %v479_v46 = vadd.f32 %v463_v38, %v447_v34  ;;  %v691_v38 = vperm.slane %v686_v23, %v1059_v7 }
 0x192   :  { %v705_v3 = vunpack.c.l.bf16 %v673_v39 }
 0x193   :  { %v527_v57 = vmax.f32 %v479_v46, 0.0 }
 0x194   :  { %v245_v37 = vpop.f32.mrf.mxu1 }
 0x195   :  { %v272_v41 = vpack.c.bf16 %v245_v37, %v245_v37 }
 0x197   :  { %v448_v47 = vunpack.c.l.bf16 %v272_v41  ;;  %v641_v31 = vpop.permute.xlu2 %640  ;;  %v664_v41 = vperm.slane %v659_v28, %v1059_v7  ;;  %v623_v54 = vpop.permute.xlu1 %622 }
 0x198   :  { %v646_v53 = vperm.slane %v641_v31, %v1059_v7  ;;  %v628_v8 = vperm.slane %v623_v54, %v1059_v7 }
 0x199   :  { %v480_v51 = vadd.f32 %v464_v43, %v448_v47  ;;  %v650_v43 = vpop.permute.xlu0 %649  ;;  %v707_v47 = vunpack.c.l.bf16 %v691_v38  ;;  %v704_v52 = vunpack.c.l.bf16 %v664_v41 }
 0x19a   :  { %v655_v46 = vperm.slane %v650_v43, %v1059_v7  ;;  %v702_v61 = vunpack.c.l.bf16 %v646_v53 }
 0x19b   :  { %v528_v56 = vmax.f32 %v480_v51, 0.0 }
 0x19c   :  { %v703_v58 = vunpack.c.l.bf16 %v655_v46 }
 0x19d   :  { %v539_v62 = vpack.c.bf16 %v528_v56, %v527_v57 }
 0x19f   :  { %578 = vmatpush.bf16.msra.mxu2 %v539_v62  ;;  %v632_v48 = vpop.permute.xlu2 %631 }
 0x1a0   :  { %v637_v59 = vperm.slane %v632_v48, %v1059_v7 }
 0x1a1   :  { %v766_v23 = vpop.permute.xlu0 %765 }
 0x1a2   :  { %v701_v26 = vunpack.c.l.bf16 %v637_v59 }
 0x1a3   :  { %579 = vmatpush.bf16.msra.mxu2 %v538_v4 }
 0x1a7   :  { %580 = vmatpush.bf16.msra.mxu2 %v537_v11 }
 0x1ab   :  { %581 = vmatpush.bf16.msra.mxu2 %v536_v14  ;;  %v700_v14 = vunpack.c.l.bf16 %v628_v8 }
 0x1af   :  { %582 = vmatpush.bf16.msra.mxu2 %v1065_v27 }
 0x1b2   :  { %583 = vmatmul.bf16.vlgmr.msra.gmra.mxu2 %v867_v15 }
 0x1c2   :  { %588 = vmatmul.bf16.gmra.mxu2 %v868_v16 }
 0x1d2   :  { %593 = vmatmul.bf16.gmra.mxu2 %v869_v17 }
 0x1e2   :  { %598 = vmatmul.bf16.gmra.mxu2 %v870_v18 }
 0x235   :  { %v584_v19 = vpop.f32.mrf.mxu2 }
 0x236   :  { %v604_v60 = vpack.c.bf16 %v584_v19, %v584_v19 }
 0x238   :  { %v692_v11 = vunpack.c.l.bf16 %v604_v60 }
 0x23a   :  { %v708_v18 = vadd.f32 %v700_v14, %v692_v11 }
 0x23c   :  { %v732_v7 = vmax.f32 %v708_v18, 0.0 }
 0x23d   :  { %v586_v20 = vpop.f32.mrf.mxu2 }
 0x23e   :  { %v605_v32 = vpack.c.bf16 %v586_v20, %v586_v20 }
 0x240   :  { %v693_v9 = vunpack.c.l.bf16 %v605_v32 }
 0x242   :  { %v709_v15 = vadd.f32 %v701_v26, %v693_v9 }
 0x245   :  { %v589_v21 = vpop.f32.mrf.mxu2 }
 0x246   :  { %v606_v49 = vpack.c.bf16 %v589_v21, %v589_v21  ;;  %v733_v21 = vmax.f32 %v709_v15, 0.0 }
 0x248   :  { %v694_v62 = vunpack.c.l.bf16 %v606_v49 }
 0x24a   :  { %v710_v12 = vadd.f32 %v702_v61, %v694_v62 }
 0x24c   :  { %v734_v19 = vmax.f32 %v710_v12, 0.0 }
 0x24d   :  { %v591_v27 = vpop.f32.mrf.mxu2 }
 0x24e   :  { %v607_v2 = vpack.c.bf16 %v591_v27, %v591_v27  ;;  %v740_v27 = vpack.c.bf16 %v733_v21, %v732_v7 }
 0x250   :  { %v695_v55 = vunpack.c.l.bf16 %v607_v2 }
 0x252   :  { %v711_v4 = vadd.f32 %v703_v58, %v695_v55 }
 0x254   :  { %v735_v17 = vmax.f32 %v711_v4, 0.0 }
 0x255   :  { %v594_v22 = vpop.f32.mrf.mxu2 }
 0x256   :  { %v608_v0 = vpack.c.bf16 %v594_v22, %v594_v22  ;;  %v741_v20 = vpack.c.bf16 %v735_v17, %v734_v19  ;;  %v744_v22 = vld [vmem:[%s1135_s6] sm:$0x1] }
 0x258   :  { %v696_v36 = vunpack.c.l.bf16 %v608_v0 }
 0x25a   :  { %v712_v5 = vadd.f32 %v704_v52, %v696_v36 }
 0x25c   :  { %v736_v13 = vmax.f32 %v712_v5, 0.0 }
 0x25d   :  { %v596_v24 = vpop.f32.mrf.mxu2 }
 0x25e   :  { %v609_v37 = vpack.c.bf16 %v596_v24, %v596_v24  ;;  %v768_v24 = vperm.slane %v766_v23, 0 }
 0x260   :  { %v697_v44 = vunpack.c.l.bf16 %v609_v37 }
 0x262   :  { %v713_v56 = vadd.f32 %v705_v3, %v697_v44 }
 0x264   :  { %v737_v10 = vmax.f32 %v713_v56, 0.0 }
 0x265   :  { %v599_v30 = vpop.f32.mrf.mxu2 }
 0x266   :  { %v610_v34 = vpack.c.bf16 %v599_v30, %v599_v30  ;;  %v742_v16 = vpack.c.bf16 %v737_v10, %v736_v13  ;;  %v770_v30 = vunpack.c.l.bf16 %v768_v24 }
 0x268   :  { %v698_v40 = vunpack.c.l.bf16 %v610_v34 }
 0x26a   :  { %v714_v50 = vadd.f32 %v706_v1, %v698_v40 }
 0x26c   :  { %v738_v6 = vmax.f32 %v714_v50, 0.0 }
 0x26d   :  { %v601_v42 = vpop.f32.mrf.mxu2 }
 0x26e   :  { %v611_v45 = vpack.c.bf16 %v601_v42, %v601_v42 }
 0x270   :  { %v699_v51 = vunpack.c.l.bf16 %v611_v45 }
 0x272   :  { %v715_v57 = vadd.f32 %v707_v47, %v699_v51 }
 0x274   :  { %v739_v29 = vmax.f32 %v715_v57, 0.0 }
 0x276   :  { %v743_v63 = vpack.c.bf16 %v739_v29, %v738_v6 }
 0x278   :  { %752 = vmatpush.bf16.msrb.mxu3 %v743_v63 }
 0x27c   :  { %753 = vmatpush.bf16.msrb.mxu3 %v742_v16 }
 0x280   :  { %754 = vmatpush.bf16.msrb.mxu3 %v741_v20 }
 0x284   :  { %755 = vmatpush.bf16.msrb.mxu3 %v740_v27 }
 0x287   :  { %854 = vmatmul.msk.bf16.vlgmr.msrb.gmra.mxu3 %vm189_vm2, %v744_v22 }
 0x30a   :  { %v757_v25 = vpop.f32.mrf.mxu3 }
 0x30b   :  { %v761_v28 = vpack.c.bf16 %v757_v25, %v757_v25 }
 0x30d   :  { %v769_v31 = vunpack.c.l.bf16 %v761_v28 }
 0x30f   :  { %v771_v33 = vadd.f32 %v770_v30, %v769_v31 }
 0x311   :  { %v772_v34 = vpack.c.bf16 %v771_v33, %v771_v33 }
 0x312   :  { %v759_v35 = vpop.f32.mrf.mxu3 }
 0x313   :  { %773 = vst [vmem:[%s1136_s8] sm:$0x1] %v772_v34 }

</bundles_post_ra>
